<compile_context>
chip_gen: v7x
topology: tpu7x:2x2x1
jax: 0.10.0
libtpu: 0.0.40
codegen_flags: <defaults>
</compile_context>

<pallas_src>
import functools

import jax
import jax.numpy as jnp
from jax.experimental import pallas as pl
from jax.experimental.pallas import tpu as pltpu

K = 3  # Conv1d kernel size; stride 1, padding='same' -> tap offsets {-1, 0, +1}


def _round_up(v, m):
    return (v + m - 1) // m * m


def dense_layer_kernel(x_ref, w1_ref, b1_ref, w2_ref, b2_ref, out_ref,
                       *, L, mxu_dtype):
    # Per grid step n (one batch element):
    #   x_ref  : (1, C_in_p, Lp)        input slab, NCL layout, lane-dense (Lp % 128 == 0)
    #   w1_ref : (H_p, K*C_in_p)        conv1 weights, im2col layout (col = k*C_in_p + c)
    #   b1_ref : (H_p, 1)
    #   w2_ref : (G_p, K*H_p)           conv2 weights, im2col layout
    #   b2_ref : (G_p, 1)
    #   out_ref: (1, C_in_p + G_p, Lp)  concat([x, y]) along (padded) channels
    _, C_in_p, Lp = x_ref.shape

    x = x_ref[0]                                              # (C_in_p, Lp)

    # Lane masks implementing the 'same' zero padding at the true sequence ends.
    lane = jax.lax.broadcasted_iota(jnp.int32, (1, Lp), 1)
    keep_left = lane >= 1          # valid lanes for the a[l-1] tap
    keep_right = lane < L - 1      # valid lanes for the a[l+1] tap

    def tap_stack(a):
        # im2col along sublanes: rows [k*C, (k+1)*C) hold the zero-padded tap
        # a[:, l + k - 1].  Shifts run on the XLU (pltpu.roll); boundary zeros
        # are a cheap VPU select.  O(L) — no (L, L) shift matmuls.
        left = jnp.where(keep_left, pltpu.roll(a, shift=1, axis=1), 0.0)        # a[l-1]
        right = jnp.where(keep_right, pltpu.roll(a, shift=Lp - 1, axis=1), 0.0)  # a[l+1]
        return jnp.concatenate([left, a, right], axis=0)      # (3*C, Lp)

    def conv_relu(w_ref, b_ref, a):
        # One MXU push per conv: (C_out_p, K*C_p) @ (K*C_p, Lp), f32 accumulate.
        stack = tap_stack(a)
        acc = jnp.dot(w_ref[...].astype(mxu_dtype), stack.astype(mxu_dtype),
                      preferred_element_type=jnp.float32)
        return jnp.maximum(acc + b_ref[...], 0.0)              # bias + ReLU

    h = conv_relu(w1_ref, b1_ref, x)                           # (H_p, Lp)
    y = conv_relu(w2_ref, b2_ref, h)                           # (G_p, Lp)
    # TODO(synk): nn.Dropout(p=0.2) is identity in eval mode; training-mode
    # stochastic dropout is not implemented.

    # concat([x, y], channel axis): two 8-sublane-aligned, full-lane row-block stores.
    out_ref[0, :C_in_p, :] = x
    out_ref[0, C_in_p:, :] = y.astype(out_ref.dtype)


def dense_layer(x_ncl, w1_pt, b1_pt, w2_pt, b2_pt, *, mxu_dtype=jnp.float32):
    """DenseLayer forward (eval mode).

    x_ncl : (N, C_in, L) float32 — PyTorch NCL layout.
    w1_pt : (H, C_in, K), b1_pt: (H,)   — PyTorch Conv1d parameter layout.
    w2_pt : (G, H,    K), b2_pt: (G,)
    mxu_dtype: use jnp.bfloat16 on v6e/v7x at production C/H/L (bf16-native MXU,
    f32 accumulation preserved); default f32 for bit-exact parity here.
    Returns (N, C_in + G, L) in NCL layout.
    """
    N, C_in, L = x_ncl.shape
    H = w1_pt.shape[0]
    G = w2_pt.shape[0]

    # Pad channels to 8 sublanes (f32) and length to 128 lanes so every
    # load/store in the kernel is a full, unmasked vreg tile.
    C_in_p = _round_up(C_in, 8)
    H_p = _round_up(H, 8)
    G_p = _round_up(G, 8)
    Lp = _round_up(L, 128)
    C_out_p = C_in_p + G_p

    x_p = jnp.pad(x_ncl.astype(jnp.float32),
                  ((0, 0), (0, C_in_p - C_in), (0, Lp - L)))

    # im2col weight layout: w_flat[o, k*C_p + c] = w_pt[o, c, k]; channel padding
    # contributes zero weights.
    w1_p = jnp.pad(w1_pt, ((0, H_p - H), (0, C_in_p - C_in), (0, 0)))
    w1_flat = jnp.transpose(w1_p, (0, 2, 1)).reshape(H_p, K * C_in_p)
    w2_p = jnp.pad(w2_pt, ((0, G_p - G), (0, H_p - H), (0, 0)))
    w2_flat = jnp.transpose(w2_p, (0, 2, 1)).reshape(G_p, K * H_p)
    b1_c = jnp.pad(b1_pt, (0, H_p - H)).reshape(H_p, 1)
    b2_c = jnp.pad(b2_pt, (0, G_p - G)).reshape(G_p, 1)

    kernel = functools.partial(dense_layer_kernel, L=L, mxu_dtype=mxu_dtype)

    out_p = pl.pallas_call(
        kernel,
        out_shape=jax.ShapeDtypeStruct((N, C_out_p, Lp), jnp.float32),
        grid_spec=pltpu.PrefetchScalarGridSpec(
            num_scalar_prefetch=0,
            # One grid step per batch element; "parallel" lets v7x megacore
            # shard the batch across both TensorCores (neutral on v5e/v6e).
            grid=(N,),
            in_specs=[
                pl.BlockSpec((1, C_in_p, Lp), lambda n: (n, 0, 0)),
                pl.BlockSpec((H_p, K * C_in_p), lambda n: (0, 0)),
                pl.BlockSpec((H_p, 1), lambda n: (0, 0)),
                pl.BlockSpec((G_p, K * H_p), lambda n: (0, 0)),
                pl.BlockSpec((G_p, 1), lambda n: (0, 0)),
            ],
            out_specs=pl.BlockSpec((1, C_out_p, Lp), lambda n: (n, 0, 0)),
        ),
        compiler_params=pltpu.CompilerParams(
            dimension_semantics=("parallel",)),
    )(x_p, w1_flat, b1_c, w2_flat, b2_c)

    # Strip channel/lane padding; padded channel order inside the slab is
    # [x rows 0:C_in_p, y rows C_in_p:C_in_p+G_p].
    return jnp.concatenate(
        [out_p[:, :C_in, :L], out_p[:, C_in_p:C_in_p + G, :L]], axis=1)


# ----------------------------- pure-JAX reference -----------------------------
def _conv1d_same_ref(x, w, b):
    # x: (N, C, L), w: (O, C, K) PyTorch layout, b: (O,)
    _, _, L = x.shape
    xp = jnp.pad(x, ((0, 0), (0, 0), (1, 1)))
    out = sum(jnp.einsum('oc,ncl->nol', w[:, :, k], xp[:, :, k:k + L])
              for k in range(K))
    return out + b[None, :, None]


def ref_dense_layer(x_ncl, w1, b1, w2, b2):
    h = jax.nn.relu(_conv1d_same_ref(x_ncl, w1, b1))
    y = jax.nn.relu(_conv1d_same_ref(h, w2, b2))
    return jnp.concatenate([x_ncl, y], axis=1)


if __name__ == "__main__":
    # Module hyperparameters (PyTorch __init__ defaults, small test shapes)
    N, C_in, L = 2, 4, 16
    growth_rate, R = 4, 1
    H = growth_rate * R   # first conv out channels
    G = growth_rate       # second conv out channels

    key = jax.random.PRNGKey(0)
    kx, kw1, kb1, kw2, kb2 = jax.random.split(key, 5)

    x = jax.random.normal(kx, (N, C_in, L), jnp.float32)          # NCL, like PyTorch
    # Parameters in PyTorch Conv1d layout: weight (out, in, k), bias (out,)
    w1 = jax.random.normal(kw1, (H, C_in, K), jnp.float32) * 0.1
    b1 = jax.random.normal(kb1, (H,), jnp.float32) * 0.1
    w2 = jax.random.normal(kw2, (G, H, K), jnp.float32) * 0.1
    b2 = jax.random.normal(kb2, (G,), jnp.float32) * 0.1

    out = jax.block_until_ready(dense_layer(x, w1, b1, w2, b2))
    ref = jax.block_until_ready(ref_dense_layer(x, w1, b1, w2, b2))

    assert out.shape == (N, C_in + G, L), out.shape
    assert jnp.allclose(out, ref, atol=1e-5, rtol=1e-4), (
        f"mismatch vs reference: max err {float(jnp.max(jnp.abs(out - ref)))}")
    print("KERNEL_OK")
</pallas_src>

<mosaic_0001>
module attributes {stable_mosaic.version = 11 : i64} {
  func.func @dense_layer_kernel(%arg0: i32, %arg1: memref<1x8x128xf32, #tpu.memory_space<vmem>>, %arg2: memref<8x24xf32, #tpu.memory_space<vmem>>, %arg3: memref<8x1xf32, #tpu.memory_space<vmem>>, %arg4: memref<8x24xf32, #tpu.memory_space<vmem>>, %arg5: memref<8x1xf32, #tpu.memory_space<vmem>>, %arg6: memref<1x16x128xf32, #tpu.memory_space<vmem>>) attributes {dimension_semantics = [#tpu.dimension_semantics<parallel>], iteration_bounds = array<i64: 2>, scalar_prefetch = 0 : i64, scratch_operands = 0 : i64, tpu.core_type = #tpu.core_type<tc>, window_params = [{transform_indices = @transform_0, window_bounds = array<i64: 1, 8, 128>}, {pipeline_mode = #tpu.pipeline_mode<synchronous>, transform_indices = @transform_1, window_bounds = array<i64: 8, 24>}, {pipeline_mode = #tpu.pipeline_mode<synchronous>, transform_indices = @transform_2, window_bounds = array<i64: 8, 1>}, {pipeline_mode = #tpu.pipeline_mode<synchronous>, transform_indices = @transform_3, window_bounds = array<i64: 8, 24>}, {pipeline_mode = #tpu.pipeline_mode<synchronous>, transform_indices = @transform_4, window_bounds = array<i64: 8, 1>}, {transform_indices = @transform_5, window_bounds = array<i64: 1, 16, 128>}]} {
    %c0 = arith.constant 0 : index
    %c0_0 = arith.constant 0 : index
    %c0_1 = arith.constant 0 : index
    %0 = vector.load %arg1[%c0, %c0_0, %c0_1] : memref<1x8x128xf32, #tpu.memory_space<vmem>>, vector<1x8x128xf32>
    %1 = vector.shape_cast %0 : vector<1x8x128xf32> to vector<8x128xf32>
    %2 = tpu.iota {dimensions = array<i32: 1>} : vector<1x128xi32>
    %c1_i32 = arith.constant 1 : i32
    %3 = vector.broadcast %c1_i32 : i32 to vector<1x128xi32>
    %4 = arith.cmpi sge, %2, %3 : vector<1x128xi32>
    %c15_i32 = arith.constant 15 : i32
    %5 = vector.broadcast %c15_i32 : i32 to vector<1x128xi32>
    %6 = arith.cmpi slt, %2, %5 : vector<1x128xi32>
    %c1_i32_2 = arith.constant 1 : i32
    %7 = tpu.dynamic_rotate %1 by %c1_i32_2 dim 1 : vector<8x128xf32>, i32 -> vector<8x128xf32>
    %cst = arith.constant 0.000000e+00 : f32
    %8 = vector.shape_cast %4 : vector<1x128xi1> to vector<1x128xi1>
    %9 = vector.broadcast %8 : vector<1x128xi1> to vector<8x128xi1>
    %10 = vector.broadcast %cst : f32 to vector<8x128xf32>
    %11 = arith.select %9, %7, %10 : vector<8x128xi1>, vector<8x128xf32>
    %c127_i32 = arith.constant 127 : i32
    %12 = tpu.dynamic_rotate %1 by %c127_i32 dim 1 : vector<8x128xf32>, i32 -> vector<8x128xf32>
    %cst_3 = arith.constant 0.000000e+00 : f32
    %13 = vector.shape_cast %6 : vector<1x128xi1> to vector<1x128xi1>
    %14 = vector.broadcast %13 : vector<1x128xi1> to vector<8x128xi1>
    %15 = vector.broadcast %cst_3 : f32 to vector<8x128xf32>
    %16 = arith.select %14, %12, %15 : vector<8x128xi1>, vector<8x128xf32>
    %17 = tpu.concatenate %11, %1, %16 in 0 : vector<8x128xf32>, vector<8x128xf32>, vector<8x128xf32> -> vector<24x128xf32>
    %c0_4 = arith.constant 0 : index
    %c0_5 = arith.constant 0 : index
    %18 = vector.load %arg2[%c0_4, %c0_5] : memref<8x24xf32, #tpu.memory_space<vmem>>, vector<8x24xf32>
    %cst_6 = arith.constant dense<0.000000e+00> : vector<8x128xf32>
    %19 = tpu.matmul %18, %17, %cst_6 {dimension_numbers = #tpu.dot_dimension_numbers<[1], [0], [0], [1], [0, 0, 1, 1], [], []>} : vector<8x24xf32>, vector<24x128xf32>, vector<8x128xf32> -> vector<8x128xf32>
    %c0_7 = arith.constant 0 : index
    %c0_8 = arith.constant 0 : index
    %20 = vector.load %arg3[%c0_7, %c0_8] : memref<8x1xf32, #tpu.memory_space<vmem>>, vector<8x1xf32>
    %21 = vector.broadcast %20 : vector<8x1xf32> to vector<8x128xf32>
    %22 = arith.addf %19, %21 : vector<8x128xf32>
    %cst_9 = arith.constant 0.000000e+00 : f32
    %23 = vector.broadcast %cst_9 : f32 to vector<8x128xf32>
    %24 = arith.maximumf %22, %23 : vector<8x128xf32>
    %c1_i32_10 = arith.constant 1 : i32
    %25 = tpu.dynamic_rotate %24 by %c1_i32_10 dim 1 : vector<8x128xf32>, i32 -> vector<8x128xf32>
    %cst_11 = arith.constant 0.000000e+00 : f32
    %26 = vector.shape_cast %4 : vector<1x128xi1> to vector<1x128xi1>
    %27 = vector.broadcast %26 : vector<1x128xi1> to vector<8x128xi1>
    %28 = vector.broadcast %cst_11 : f32 to vector<8x128xf32>
    %29 = arith.select %27, %25, %28 : vector<8x128xi1>, vector<8x128xf32>
    %c127_i32_12 = arith.constant 127 : i32
    %30 = tpu.dynamic_rotate %24 by %c127_i32_12 dim 1 : vector<8x128xf32>, i32 -> vector<8x128xf32>
    %cst_13 = arith.constant 0.000000e+00 : f32
    %31 = vector.shape_cast %6 : vector<1x128xi1> to vector<1x128xi1>
    %32 = vector.broadcast %31 : vector<1x128xi1> to vector<8x128xi1>
    %33 = vector.broadcast %cst_13 : f32 to vector<8x128xf32>
    %34 = arith.select %32, %30, %33 : vector<8x128xi1>, vector<8x128xf32>
    %35 = tpu.concatenate %29, %24, %34 in 0 : vector<8x128xf32>, vector<8x128xf32>, vector<8x128xf32> -> vector<24x128xf32>
    %c0_14 = arith.constant 0 : index
    %c0_15 = arith.constant 0 : index
    %36 = vector.load %arg4[%c0_14, %c0_15] : memref<8x24xf32, #tpu.memory_space<vmem>>, vector<8x24xf32>
    %cst_16 = arith.constant dense<0.000000e+00> : vector<8x128xf32>
    %37 = tpu.matmul %36, %35, %cst_16 {dimension_numbers = #tpu.dot_dimension_numbers<[1], [0], [0], [1], [0, 0, 1, 1], [], []>} : vector<8x24xf32>, vector<24x128xf32>, vector<8x128xf32> -> vector<8x128xf32>
    %c0_17 = arith.constant 0 : index
    %c0_18 = arith.constant 0 : index
    %38 = vector.load %arg5[%c0_17, %c0_18] : memref<8x1xf32, #tpu.memory_space<vmem>>, vector<8x1xf32>
    %39 = vector.broadcast %38 : vector<8x1xf32> to vector<8x128xf32>
    %40 = arith.addf %37, %39 : vector<8x128xf32>
    %cst_19 = arith.constant 0.000000e+00 : f32
    %41 = vector.broadcast %cst_19 : f32 to vector<8x128xf32>
    %42 = arith.maximumf %40, %41 : vector<8x128xf32>
    %c0_20 = arith.constant 0 : index
    %c0_21 = arith.constant 0 : index
    %c0_22 = arith.constant 0 : index
    %43 = vector.load %arg6[%c0_20, %c0_21, %c0_22] : memref<1x16x128xf32, #tpu.memory_space<vmem>>, vector<1x8x128xf32>
    %44 = vector.shape_cast %43 : vector<1x8x128xf32> to vector<8x128xf32>
    %45 = vector.shape_cast %1 : vector<8x128xf32> to vector<1x8x128xf32>
    tpu.vector_store %arg6[%c0_20, %c0_21, %c0_22], %45 {strides = array<i32>} : memref<1x16x128xf32, #tpu.memory_space<vmem>>, vector<1x8x128xf32>,
    %c0_23 = arith.constant 0 : index
    %c8 = arith.constant 8 : index
    %c0_24 = arith.constant 0 : index
    %46 = vector.load %arg6[%c0_23, %c8, %c0_24] : memref<1x16x128xf32, #tpu.memory_space<vmem>>, vector<1x8x128xf32>
    %47 = vector.shape_cast %46 : vector<1x8x128xf32> to vector<8x128xf32>
    %48 = vector.shape_cast %42 : vector<8x128xf32> to vector<1x8x128xf32>
    tpu.vector_store %arg6[%c0_23, %c8, %c0_24], %48 {strides = array<i32>} : memref<1x16x128xf32, #tpu.memory_space<vmem>>, vector<1x8x128xf32>,
    return
  }
  func.func @transform_0(%arg0: i32) -> (i32, i32, i32) {
    %c0_i32 = arith.constant 0 : i32
    %c0_i32_0 = arith.constant 0 : i32
    %c0_i32_1 = arith.constant 0 : i32
    return %arg0, %c0_i32, %c0_i32_0 : i32, i32, i32
  }
  func.func @transform_1(%arg0: i32) -> (i32, i32) {
    %c0_i32 = arith.constant 0 : i32
    %c0_i32_0 = arith.constant 0 : i32
    %c0_i32_1 = arith.constant 0 : i32
    return %c0_i32, %c0_i32_0 : i32, i32
  }
  func.func @transform_2(%arg0: i32) -> (i32, i32) {
    %c0_i32 = arith.constant 0 : i32
    %c0_i32_0 = arith.constant 0 : i32
    %c0_i32_1 = arith.constant 0 : i32
    return %c0_i32, %c0_i32_0 : i32, i32
  }
  func.func @transform_3(%arg0: i32) -> (i32, i32) {
    %c0_i32 = arith.constant 0 : i32
    %c0_i32_0 = arith.constant 0 : i32
    %c0_i32_1 = arith.constant 0 : i32
    return %c0_i32, %c0_i32_0 : i32, i32
  }
  func.func @transform_4(%arg0: i32) -> (i32, i32) {
    %c0_i32 = arith.constant 0 : i32
    %c0_i32_0 = arith.constant 0 : i32
    %c0_i32_1 = arith.constant 0 : i32
    return %c0_i32, %c0_i32_0 : i32, i32
  }
  func.func @transform_5(%arg0: i32) -> (i32, i32, i32) {
    %c0_i32 = arith.constant 0 : i32
    %c0_i32_0 = arith.constant 0 : i32
    %c0_i32_1 = arith.constant 0 : i32
    return %arg0, %c0_i32, %c0_i32_0 : i32, i32, i32
  }
}

</mosaic_0001>

<bundles_post_ra>
// kernel: tpu_custom_call.1
= control target key start
LH: loop header
LB: loop body
LE: loop exit
PB: predicated region body
PF: predicated region fallthrough
CT: control target
= control target key end

     0   :  { %10 = vsyncpa [#allocation3], 0  ;;  %s927_s0 = inlined_call_operand.vmem [shape: f32[2,8,128], index: 0, kind: input, shape index: {}]   ;;  %s928_s1 = inlined_call_operand.hbm [shape: f32[8,24], index: 1, kind: input, shape index: {}]   ;;  %s929_s2 = inlined_call_operand.vmem [shape: f32[8,1], index: 2, kind: input, shape index: {}]   ;;  %s930_s3 = inlined_call_operand.vmem [shape: f32[8,24], index: 3, kind: input, shape index: {}]   ;;  %s931_s4 = inlined_call_operand.vmem [shape: f32[8,1], index: 4, kind: input, shape index: {}]   ;;  %s932_s5 = inlined_call_operand.hbm [shape: f32[2,16,128], index: 5, kind: output, shape index: {}]  }
   0x1   :  { %11 = vsyncpa [#allocation4], 0 }
   0x2   :  { %13 = vsyncpa [#allocation4 + $0x1], 0  ;;  %s759_s18 = smov 0   ;;  %s761_s19 = smov 0  }
   0x3   :  { %s763_s20 = smov 0   ;;  %s765_s21 = smov 0  }
   0x4 LB: > { %s780_s22 = sadd.s32 4294967295, %s716_s21   ;;  %s507_s23 = sadd.s32 4294967294, %s716_s21   ;;  %s716_s21 = sphi %s765_s21, %s950_s21   ;;  %s712_s20 = sphi %s763_s20, %s949_s20   ;;  %s708_s19 = sphi %s761_s19, %s948_s19   ;;  %s704_s18 = sphi %s759_s18, %s947_s18  }
   0x5   : > { %s784_s24 = sadd.s32 1, %s716_s21   ;;  %s136_s25 = sadd.s32 1, %s712_s20 }
   0x6   : > { %s133_s26 = ssub.s32 %s716_s21, %s784_s24  ;;  %p146_p0 = scmp.ne.s32.totalorder %s712_s20, %s708_s19 }
   0x7   : > { %p134_p1 = scmp.eq.s32.totalorder %s133_s26, 0  ;;  %p147_p2 = scmp.eq.s32.totalorder %s780_s22, 1 }
   0x8   : > { %p152_p3 = scmp.ne.s32.totalorder %s708_s19, %s704_s18  ;;  %p153_p4 = scmp.eq.s32.totalorder %s507_s23, 1 }
   0x9   : > { %s795_s27 = scalar_select %p134_p1, %s712_s20, %s136_s25  }
   0xa   : > { %p797_p5 = por %p147_p2, %p146_p0  ;;  %p801_p6 = por %p153_p4, %p152_p3 }
   0xb   : > { %p508_p7 = scmp.ge.s32.totalorder %s716_s21, 1  ;;  %p160_p8 = scmp.lt.s32.totalorder %s716_s21, 3 }
   0xc   : > { %s936_s28 = scalar_select %p797_p5, 1, 0 }
   0xd   : > { %s937_s29 = scalar_select %p801_p6, 1, 0 }
   0xe   : > { %p933_p9 = scmp.eq.s32.totalorder %s780_s22, 0  ;;  %p808_p10 = pnand %p508_p7, %p160_p8 }
   0xf   : > { %s718_s6 = smov [#allocation2]   ;;  %s622_s11 = scalar_lea.hbm %s928_s1, 128 }
  0x10   : > { %s938_s30 = scalar_select %p808_p10, 1, 0 }
  0x11   : > { %s173_s7 = sshll.u32 %s718_s6, 4  ;;  %p567_p11 = pneg %p808_p10  ;;  %s174_s7 = int_to_ptr.vmem [resolvable:$true] %s173_s7 }
  0x12   : > { %p623_p13 = scmp.ne.s32.totalorder %s928_s1, %s622_s11  ;;  %p629_p3 = scmp.lt.u32.totalorder %s622_s11, %s928_s1 }
  0x13   : > { %p816_p12 = pnand %p933_p9, %p567_p11 }
  0x15   : > { %p624_p0 = pneg %p816_p12 }
  0x17   : > { %p625_p1 = pnand %p624_p0, %p623_p13 }
  0x19   : > { %p626_p2 = pneg %p625_p1 }
  0x1b   : > { %p631_p4 = pnand %p629_p3, %p626_p2 }
  0x1d   : > { %634 = shalt.err (!%p631_p4)
}
  0x1e   : > { %s635_s16 = scalar_lea.vmem %s174_s7, 128  ;;  %p643_p9 = scmp.lt.s32.totalorder %s174_s7, %s174_s7 }
  0x1f   : > { %p636_p7 = scmp.ne.s32.totalorder %s174_s7, %s635_s16  ;;  %p644_p6 = scmp.lt.s32.totalorder %s635_s16, %s635_s16 }
  0x21   : > { %p638_p8 = pnand %p636_p7, %p624_p0  ;;  %p645_p5 = por %p644_p6, %p643_p9 }
  0x23   : > { %p639_p11 = pneg %p638_p8 }
  0x25   : > { %p646_p10 = pnand %p645_p5, %p639_p11 }
  0x27   : > { %649 = shalt.err (!%p646_p10)
}
  0x28   : > { %570 = dma.hbm_to_vmem [thread:$0]  (!%p816_p12), %s928_s1, 128, %s174_s7, [#allocation3]  }
  0x29   : > { %p940_p13 = scmp.ne.s32.totalorder %s938_s30, 0 }
  0x2a   : > { %p941_p1 = scmp.eq.s32.totalorder (!%p940_p13), %s780_s22, 0 }
  0x2b   : > { %202 = sbr.rel (%p940_p13) target bundleno = 749 (0x2ed), region = 40 }
  0x32   : > { %695 = dma.done.wait (%p941_p1), [#allocation3], 128   ;;  %p942_p0 = pmov %p941_p1 }
  0x33   : > { %s226_s25 = sand.u32 1, %s708_s19   ;;  %p229_p5 = scmp.lt.s32.totalorder %s780_s22, 1  ;;  %v719_v0 = vmov 0.0|0.0   ;;  %vm720_vm0 = vmmov 0   ;;  %v721_v1 = vmov 0.0   ;;  %v722_v2 = vmov 0  }
  0x34   : > { %697 = vsyncadd (%p942_p0), [#allocation3], 4294967168  ;;  %553 = vmatprep.subr.bf16.mxu0 %v719_v0  ;;  %557 = vmatprep.subr.bf16.mxu1 %v719_v0  ;;  %s513_s26 = sshll.u32 %s226_s25, 4  ;;  %v249_v4 = vld [vmem:[%s929_s2] sm:$0xff]  ;;  %s723_s12 = smov 1   ;;  %v234_v5 = vlaneseq  ;;  %vm725_vm2 = vmmov 1  }
  0x35   : > { %541 = vmatprep.mubr.msk.f32.mxu0 %vm720_vm0, %v721_v1  ;;  %550 = vmatprep.mubr.msk.f32.mxu1 %vm720_vm0, %v721_v1  ;;  %s230_s30 = scalar_select %p229_p5, %s780_s22, 1  ;;  %v248_v11 = vld [vmem:[#allocation2] sm:$0xff]  ;;  %vm255_vm5 = vcmask 195584  }
  0x36   : > { %620 = vset.pattern.permute.xlu1 %v722_v2  ;;  %621 = vset.pattern.permute.xlu0 %v722_v2  ;;  %s853_s13 = scalar_lea.vmem [#allocation5], %s513_s26  ;;  %s724_s14 = smov 127   ;;  %v235_v6 = vand.u32 127, %v234_v5  ;;  %v337_v17 = vld [vmem:[%s931_s4] sm:$0xff] }
  0x37   : > { %s514_s6 = sshll.u32 %s230_s30, 3  ;;  %252 = vperm.xlu1 %620, %v249_v4   ;;  %v336_v20 = vld [vmem:[%s930_s3] sm:$0xff]  ;;  %s433_s26 = sshll.u32 %s853_s13, 4  ;;  %s876_s26 = int_to_ptr.vmem [resolvable:$true] %s433_s26 }
  0x38   : > { %s232_s9 = scalar_lea.vmem %s927_s0, %s514_s6  ;;  %vm236_vm1 = vcmp.ge.s32.totalorder %v235_v6, 1  ;;  %vm237_vm4 = vcmp.lt.s32.totalorder %v235_v6, 15  ;;  %s526_s30 = sshll.u32 %s780_s22, 8 }
  0x39   : > { %v233_v3 = vld [vmem:[%s232_s9] sm:$0xff]  ;;  %vm856_vm3 = vmpackc.low %vm725_vm2, %vm236_vm1  ;;  %s881_s8 = scalar_lea.hbm %s932_s5, %s526_s30  ;;  %s886_s9 = scalar_lea.sflag [#allocation4], %s226_s25 }
  0x3a   : > { %238 = vrot.lane.b32.xlu0 %v233_v3, %s723_s12  ;;  %417 = vst [vmem:[%s853_s13] sm:$0xff] %v233_v3  ;;  %s650_s22 = scalar_lea.vmem %s876_s26, 256  ;;  %p945_p9 = scmp.ne.s32.totalorder %s936_s28, 0 }
  0x3b   : > { %p651_p6 = scmp.ne.s32.totalorder %s876_s26, %s650_s22  ;;  %s726_s10 = smov [#allocation5]  }
  0x3c   : > { %s654_s11 = sshll.u32 %s726_s10, 4  ;;  %s655_s11 = int_to_ptr.vmem [resolvable:$false] %s654_s11 }
  0x3d   : > { %p652_p10 = pnand %p651_p6, %p945_p9  ;;  %p657_p2 = scmp.lt.s32.totalorder %s876_s26, %s655_s11 }
  0x3e   : > { %243 = vrot.lane.b32.xlu0 %v233_v3, %s724_s14 }
  0x3f   : > { %p653_p12 = pneg %p652_p10 }
  0xac   : > { %v239_v7 = vpop.permute.xlu0 %238 }
  0xad   : > { %v554_v9 = vpack.c.bf16 %v233_v3, %v239_v7 }
  0xaf   : > { %556 = vmatpush3.bf16.msk.msra.mxu0 %vm856_vm3, %v554_v9 }
  0xb0   : > { %539 = vmatprep.subr.mxu0 %v721_v1  ;;  %v244_v10 = vpop.permute.xlu0 %243 }
  0xb3   : > { %540 = vmatpush3.msk.msra.mxu0 %vm237_vm4, %v244_v10 }
  0xb4   : > { %542 = vmatmul.mubr.msk.f32.vlgmr.msra.gmra.mrb[0].mxu0 %vm255_vm5, %v248_v11 }
  0xb6   : > { %v253_v12 = vpop.permute.xlu1 %252 }
 0x187   : > { %v325_v13 = vpop.f32.mrb[0].mxu0 }
 0x188   : > { %v326_v14 = vadd.f32 %v325_v13, %v253_v12  ;;  %v543_v15 = vpop.f32.mrb[1].mxu0 }
 0x18a   : > { %v329_v16 = vmax.f32 %v326_v14, 0.0 }
 0x18c   : > { %333 = vrot.lane.b32.xlu0 %v329_v16, %s724_s14  ;;  %330 = vrot.lane.b32.xlu1 %v329_v16, %s723_s12  ;;  %s656_s12 = scalar_lea.vmem %s655_s11, 512 }
 0x18d   : > { %p658_p3 = scmp.lt.s32.totalorder %s656_s12, %s650_s22 }
 0x18f   : > { %p659_p4 = por %p658_p3, %p657_p2 }
 0x190   : > { %340 = vperm.xlu1 %620, %v337_v17  }
 0x191   : > { %p660_p7 = pnand %p659_p4, %p653_p12 }
 0x1fe   : > { %v331_v18 = vpop.permute.xlu1 %330  ;;  %v334_v21 = vpop.permute.xlu0 %333 }
 0x1ff   : > { %v558_v19 = vpack.c.bf16 %v329_v16, %v331_v18 }
 0x201   : > { %560 = vmatpush3.bf16.msk.msra.mxu1 %vm856_vm3, %v558_v19 }
 0x202   : > { %548 = vmatprep.subr.mxu1 %v721_v1 }
 0x205   : > { %549 = vmatpush3.msk.msra.mxu1 %vm237_vm4, %v334_v21 }
 0x206   : > { %551 = vmatmul.mubr.msk.f32.vlgmr.msra.gmra.mrb[0].mxu1 %vm255_vm5, %v336_v20 }
 0x20f   : > { %v341_v22 = vpop.permute.xlu1 %340 }
 0x2d9   : > { %v412_v23 = vpop.f32.mrb[0].mxu1 }
 0x2da   : > { %v413_v24 = vadd.f32 %v412_v23, %v341_v22  ;;  %v552_v25 = vpop.f32.mrb[1].mxu1 }
 0x2dc   : > { %v416_v26 = vmax.f32 %v413_v24, 0.0 }
 0x2de   : > { %418 = vst [vmem:[%s853_s13 + $0x8] sm:$0xff] %v416_v26 }
 0x2df   : > { %663 = shalt.err (!%p660_p7)
}
 0x2e0   : > { %s664_s25 = scalar_lea.hbm %s881_s8, 256  ;;  %s668_s15 = scalar_lea.hbm %s932_s5, 512 }
 0x2e1   : > { %p665_p8 = scmp.ne.s32.totalorder %s881_s8, %s664_s25  ;;  %p669_p1 = scmp.lt.u32.totalorder %s881_s8, %s932_s5 }
 0x2e2   : > { %p670_p0 = scmp.lt.u32.totalorder %s668_s15, %s664_s25  ;;  %p672_p6 = scmp.lt.u32.totalorder %s664_s25, %s881_s8 }
 0x2e3   : > { %p666_p11 = pnand %p665_p8, %p945_p9 }
 0x2e4   : > { %p671_p5 = por %p670_p0, %p669_p1 }
 0x2e5   : > { %p667_p13 = pneg %p666_p11 }
 0x2e6   : > { %p673_p10 = por %p672_p6, %p671_p5 }
 0x2e8   : > { %p674_p12 = pnand %p673_p10, %p667_p13 }
 0x2ea   : > { %677 = shalt.err (!%p674_p12)
}
 0x2eb   : > { %s727_s23 = smov 128   ;;  %s728_s30 = smov 8  }
 0x2ec   : > { %565 = dma.vmem_to_hbm [thread:$0]  (%p945_p9), %s876_s26, 256, %s881_s8, %s886_s9, %s727_s23, %s727_s23, %s728_s30  }
 0x2ed PF: > { %p577_p2 = scmp.ge.s32.totalorder %s716_s21, 2  ;;  %s448_s6 = sand.u32 1, %s704_s18  }
 0x2ee   : > { %p946_p3 = scmp.ne.s32.totalorder %s937_s29, 0  ;;  %s449_s7 = scalar_lea.sflag [#allocation4], %s448_s6 }
 0x2f0   : > { %p572_p4 = pnand %p577_p2, %p946_p3 }
 0x2f2   : > { %699 = dma.done.wait (!%p572_p4), %s449_s7, 256  }
 0x2f3   : > { %701 = vsyncadd (!%p572_p4), %s449_s7, 4294967040  ;;  %p16_p7 = scmp.ge.s32.totalorder %s784_s24, 4   ;;  %s947_s18 = smov %s708_s19 }
 0x2f4   : > { %s948_s19 = smov %s712_s20  ;;  %s949_s20 = smov %s795_s27 }
 0x2f5   : > { %s950_s21 = smov %s784_s24  ;;  %18 = sbr.rel (!%p16_p7) target bundleno = 4 (0x4), region = 80 }
 0x2fc   :  { %454 = vsyncpa [#allocation3], 1 }
 0x2fd   :  { %456 = vsyncpa [#allocation3 + $0x1], 1 }
 0x2fe   :  { %457 = vsyncpa [#allocation4], 1 }
 0x2ff   :  { %459 = vsyncpa [#allocation4 + $0x1], 1 }

</bundles_post_ra>
